<compile_context>
chip_gen: v7x
topology: tpu7x:2x2x1
jax: 0.10.0
libtpu: 0.0.40
codegen_flags: <defaults>
</compile_context>

<pallas_src>
import jax
import jax.numpy as jnp
import numpy as np
from jax.experimental import pallas as pl
from jax.experimental.pallas import tpu as pltpu


def _attention_kernel(enc_ref, v_ref, out_ref, m_sc, l_sc, acc_sc):
    """Grid step (b, k): fold a (tb, ts, H) encoder slab into the online
    softmax / context accumulators; finalize on the last sequence block."""
    k = pl.program_id(1)

    @pl.when(k == 0)
    def _init():
        m_sc[...] = jnp.full(m_sc.shape, -jnp.inf, dtype=m_sc.dtype)
        l_sc[...] = jnp.zeros(l_sc.shape, dtype=l_sc.dtype)
        acc_sc[...] = jnp.zeros(acc_sc.shape, dtype=acc_sc.dtype)

    enc = enc_ref[...].astype(jnp.float32)                  # (tb, ts, H)
    tb, _, H = enc.shape
    v = jnp.broadcast_to(v_ref[...], (tb, 1, H))            # (tb, 1, H)

    # scores (tb, 1, ts): batched MXU contraction over H, lane-dense in ts.
    s = jnp.einsum("bqh,bkh->bqk", v, enc,
                   preferred_element_type=jnp.float32)

    m_prev = m_sc[...]                                       # (tb, 1, 1)
    m_new = jnp.maximum(m_prev, jnp.max(s, axis=-1, keepdims=True))
    alpha = jnp.exp(m_prev - m_new)
    p = jnp.exp(s - m_new)                                   # (tb, 1, ts)

    l_sc[...] = alpha * l_sc[...] + jnp.sum(p, axis=-1, keepdims=True)
    # context accumulation: batched MXU contraction over the sequence tile.
    acc_sc[...] = alpha * acc_sc[...] + jnp.einsum(
        "bqk,bkh->bqh", p, enc, preferred_element_type=jnp.float32)
    m_sc[...] = m_new

    @pl.when(k == pl.num_programs(1) - 1)
    def _finalize():
        denom = l_sc[...]                                    # (tb, 1, 1)
        r = pl.reciprocal(denom, approx=True)                # EUP vrcp
        r = r * (2.0 - denom * r)                            # Newton step
        out_ref[...] = (acc_sc[...] * r).astype(out_ref.dtype)


def _round_up(x, m):
    return ((x + m - 1) // m) * m


def _divisors_desc(n):
    return [d for d in range(n, 0, -1) if n % d == 0]


def _pick_tiles(B, S, H, itemsize=4, block_budget_bytes=8 << 20):
    """VMEM-budget-aware tiles: (tb, ts) such that the (tb, ts, H) encoder
    slab (with sublane/lane padding) stays under `block_budget_bytes`."""
    Hp = _round_up(H, 128)                                   # lane padding

    def enc_block_bytes(tb, ts):
        return tb * _round_up(ts, 8) * Hp * itemsize         # sublane padding

    # Sequence tile: whole sequence unless one batch row already blows the
    # budget; then the largest proper divisor of S that is a multiple of 8
    # (sublane granularity) and fits.  Online softmax keeps this exact.
    ts = S
    if enc_block_bytes(1, S) > block_budget_bytes:
        for d in _divisors_desc(S):
            if d < S and d % 8 == 0 and enc_block_bytes(1, d) <= block_budget_bytes:
                ts = d
                break

    # Batch tile: largest divisor of B whose block still fits the budget
    # (fewest grid steps; large inputs still produce many "parallel" steps).
    tb = 1
    for d in _divisors_desc(B):
        if enc_block_bytes(d, ts) <= block_budget_bytes:
            tb = d
            break

    return tb, ts, enc_block_bytes(tb, ts)


def attention_forward(hidden_state, encoder_outputs, params):
    """hidden_state: (B, H), encoder_outputs: (B, S, H). Returns (B, H)."""
    B, S, H = encoder_outputs.shape
    (w1, b1), (w2, b2), (w3, b3), (w4, b4), wv = params

    # Fold the purely linear layer stack into a single (1, H) score vector.
    # The hidden-state branch and all four biases add a per-batch constant
    # along the sequence axis and cancel under softmax(dim=1), so the
    # forward output (context) is mathematically unchanged.
    del hidden_state
    v_row = ((((wv @ w4) @ w3) @ w2) @ w1[:, :H]).astype(jnp.float32)
    v_row = v_row.reshape(1, 1, H)

    tb, ts, blk_bytes = _pick_tiles(B, S, H, itemsize=4)

    # Explicit scoped-VMEM limit: >= double-buffered enc slab + headroom,
    # never below the 32 MiB v6e/v7x default, capped chip-safe at 48 MiB
    # (v5e default 16 MiB would otherwise reject large tiles; v7x has only
    # 64 MiB physical so we stay well under it).
    vmem_limit = int(min(48 << 20, max(32 << 20, 2 * blk_bytes + (4 << 20))))

    out = pl.pallas_call(
        _attention_kernel,
        out_shape=jax.ShapeDtypeStruct((B, 1, H), encoder_outputs.dtype),
        grid_spec=pltpu.PrefetchScalarGridSpec(
            num_scalar_prefetch=0,
            grid=(B // tb, S // ts),
            in_specs=[
                pl.BlockSpec((tb, ts, H), lambda b, k: (b, k, 0)),  # encoder slab
                pl.BlockSpec((1, 1, H), lambda b, k: (0, 0, 0)),    # folded score vec
            ],
            out_specs=pl.BlockSpec((tb, 1, H), lambda b, k: (b, 0, 0)),
            scratch_shapes=[
                pltpu.VMEM((tb, 1, 1), jnp.float32),   # running max
                pltpu.VMEM((tb, 1, 1), jnp.float32),   # running denom
                pltpu.VMEM((tb, 1, H), jnp.float32),   # running context
            ],
        ),
        compiler_params=pltpu.CompilerParams(
            dimension_semantics=("parallel", "arbitrary"),
            vmem_limit_bytes=vmem_limit),
    )(encoder_outputs, v_row)

    return out.reshape(B, H)


def reference_forward(hidden_state, encoder_outputs, params):
    """Pure-JAX mirror of the PyTorch module (full un-folded chain)."""
    B, S, H = encoder_outputs.shape
    (w1, b1), (w2, b2), (w3, b3), (w4, b4), wv = params
    hs = jnp.broadcast_to(hidden_state[:, None, :], (B, S, H))
    x = jnp.concatenate([encoder_outputs, hs], axis=2).reshape(-1, 2 * H)
    x = x @ w1.T + b1
    x = x @ w2.T + b2
    x = x @ w3.T + b3
    x = x @ w4.T + b4
    scores = (x @ wv.T).reshape(B, S)
    attn = jax.nn.softmax(scores, axis=1)
    return jnp.einsum("bs,bsh->bh", attn, encoder_outputs)


def init_params(key, hidden_size):
    """Deterministic torch-Linear-shaped parameters (out_features, in_features)."""
    H = hidden_size
    ks = jax.random.split(key, 9)
    scale1 = 1.0 / jnp.sqrt(2.0 * H)
    scale = 1.0 / jnp.sqrt(1.0 * H)
    w1 = jax.random.uniform(ks[0], (H, 2 * H), jnp.float32, -scale1, scale1)
    b1 = jax.random.uniform(ks[1], (H,), jnp.float32, -scale1, scale1)
    w2 = jax.random.uniform(ks[2], (H, H), jnp.float32, -scale, scale)
    b2 = jax.random.uniform(ks[3], (H,), jnp.float32, -scale, scale)
    w3 = jax.random.uniform(ks[4], (H, H), jnp.float32, -scale, scale)
    b3 = jax.random.uniform(ks[5], (H,), jnp.float32, -scale, scale)
    w4 = jax.random.uniform(ks[6], (H, H), jnp.float32, -scale, scale)
    b4 = jax.random.uniform(ks[7], (H,), jnp.float32, -scale, scale)
    wv = jax.random.uniform(ks[8], (1, H), jnp.float32, -scale, scale)
    return (w1, b1), (w2, b2), (w3, b3), (w4, b4), wv


if __name__ == "__main__":
    B, S, H = 2, 8, 32
    key = jax.random.PRNGKey(0)
    k_hid, k_enc, k_par = jax.random.split(key, 3)

    hidden_state = jax.random.normal(k_hid, (B, H), jnp.float32)
    encoder_outputs = jax.random.normal(k_enc, (B, S, H), jnp.float32)
    params = init_params(k_par, H)

    context = attention_forward(hidden_state, encoder_outputs, params)
    context = jax.block_until_ready(context)

    ref = jax.block_until_ready(
        reference_forward(hidden_state, encoder_outputs, params))
    np.testing.assert_allclose(np.asarray(context), np.asarray(ref),
                               rtol=1e-4, atol=1e-5)
    print("KERNEL_OK")
</pallas_src>

<mosaic_0001>
module attributes {stable_mosaic.version = 11 : i64} {
  func.func @_attention_kernel(%arg0: i32, %arg1: i32, %arg2: memref<2x8x32xf32, #tpu.memory_space<vmem>>, %arg3: memref<1x1x32xf32, #tpu.memory_space<vmem>>, %arg4: memref<2x1x32xf32, #tpu.memory_space<vmem>>, %arg5: memref<2x1x1xf32, #tpu.memory_space<vmem>>, %arg6: memref<2x1x1xf32, #tpu.memory_space<vmem>>, %arg7: memref<2x1x32xf32, #tpu.memory_space<vmem>>) attributes {dimension_semantics = [#tpu.dimension_semantics<parallel>, #tpu.dimension_semantics<arbitrary>], iteration_bounds = array<i64: 1, 1>, scalar_prefetch = 0 : i64, scratch_operands = 3 : i64, tpu.core_type = #tpu.core_type<tc>, window_params = [{transform_indices = @transform_0, window_bounds = array<i64: 2, 8, 32>}, {pipeline_mode = #tpu.pipeline_mode<synchronous>, transform_indices = @transform_1, window_bounds = array<i64: 1, 1, 32>}, {transform_indices = @transform_2, window_bounds = array<i64: 2, 1, 32>}]} {
    %c0_i32 = arith.constant 0 : i32
    %0 = arith.cmpi eq, %arg1, %c0_i32 : i32
    %1 = arith.extui %0 : i1 to i32
    %c0_i32_0 = arith.constant 0 : i32
    %2 = arith.cmpi ne, %1, %c0_i32_0 : i32
    scf.if %2 {
      %cst_29 = arith.constant 0xFF800000 : f32
      %33 = vector.broadcast %cst_29 : f32 to vector<2x1x1xf32>
      %c0_30 = arith.constant 0 : index
      %c0_31 = arith.constant 0 : index
      %c0_32 = arith.constant 0 : index
      %34 = vector.load %arg5[%c0_30, %c0_31, %c0_32] : memref<2x1x1xf32, #tpu.memory_space<vmem>>, vector<2x1x1xf32>
      tpu.vector_store %arg5[%c0_30, %c0_31, %c0_32], %33 {strides = array<i32>} : memref<2x1x1xf32, #tpu.memory_space<vmem>>, vector<2x1x1xf32>,
      %cst_33 = arith.constant 0.000000e+00 : f32
      %35 = vector.broadcast %cst_33 : f32 to vector<2x1x1xf32>
      %c0_34 = arith.constant 0 : index
      %c0_35 = arith.constant 0 : index
      %c0_36 = arith.constant 0 : index
      %36 = vector.load %arg6[%c0_34, %c0_35, %c0_36] : memref<2x1x1xf32, #tpu.memory_space<vmem>>, vector<2x1x1xf32>
      tpu.vector_store %arg6[%c0_34, %c0_35, %c0_36], %35 {strides = array<i32>} : memref<2x1x1xf32, #tpu.memory_space<vmem>>, vector<2x1x1xf32>,
      %cst_37 = arith.constant 0.000000e+00 : f32
      %37 = vector.broadcast %cst_37 : f32 to vector<2x1x32xf32>
      %c0_38 = arith.constant 0 : index
      %c0_39 = arith.constant 0 : index
      %c0_40 = arith.constant 0 : index
      %38 = vector.load %arg7[%c0_38, %c0_39, %c0_40] : memref<2x1x32xf32, #tpu.memory_space<vmem>>, vector<2x1x32xf32>
      tpu.vector_store %arg7[%c0_38, %c0_39, %c0_40], %37 {strides = array<i32>} : memref<2x1x32xf32, #tpu.memory_space<vmem>>, vector<2x1x32xf32>,
    } else {
    }
    %c0 = arith.constant 0 : index
    %c0_1 = arith.constant 0 : index
    %c0_2 = arith.constant 0 : index
    %3 = vector.load %arg2[%c0, %c0_1, %c0_2] : memref<2x8x32xf32, #tpu.memory_space<vmem>>, vector<2x8x32xf32>
    %c0_3 = arith.constant 0 : index
    %c0_4 = arith.constant 0 : index
    %c0_5 = arith.constant 0 : index
    %4 = vector.load %arg3[%c0_3, %c0_4, %c0_5] : memref<1x1x32xf32, #tpu.memory_space<vmem>>, vector<1x1x32xf32>
    %5 = vector.shape_cast %4 : vector<1x1x32xf32> to vector<1x1x32xf32>
    %6 = vector.broadcast %5 : vector<1x1x32xf32> to vector<2x1x32xf32>
    "tpu.trace_start"() <{level = 10 : i32, message = "bqh,bkh->bqk"}> : () -> ()
    %cst = arith.constant dense<0.000000e+00> : vector<2x1x8xf32>
    %7 = tpu.matmul %6, %3, %cst {dimension_numbers = #tpu.dot_dimension_numbers<[2], [2], [1], [1], [0, 0, 0, 1, 1, 1], [0], [0]>} : vector<2x1x32xf32>, vector<2x8x32xf32>, vector<2x1x8xf32> -> vector<2x1x8xf32>
    "tpu.trace_stop"() : () -> ()
    %c0_6 = arith.constant 0 : index
    %c0_7 = arith.constant 0 : index
    %c0_8 = arith.constant 0 : index
    %8 = vector.load %arg5[%c0_6, %c0_7, %c0_8] : memref<2x1x1xf32, #tpu.memory_space<vmem>>, vector<2x1x1xf32>
    %cst_9 = arith.constant dense<0xFF800000> : vector<2x1xf32>
    %9 = vector.multi_reduction <maximumf>, %7, %cst_9 [2] : vector<2x1x8xf32> to vector<2x1xf32>
    %10 = vector.shape_cast %9 : vector<2x1xf32> to vector<2x1x1xf32>
    %11 = arith.maximumf %8, %10 : vector<2x1x1xf32>
    %12 = arith.subf %8, %11 : vector<2x1x1xf32>
    %13 = math.exp %12 : vector<2x1x1xf32>
    %14 = vector.broadcast %11 : vector<2x1x1xf32> to vector<2x1x8xf32>
    %15 = arith.subf %7, %14 : vector<2x1x8xf32>
    %16 = math.exp %15 : vector<2x1x8xf32>
    %c0_10 = arith.constant 0 : index
    %c0_11 = arith.constant 0 : index
    %c0_12 = arith.constant 0 : index
    %17 = vector.load %arg6[%c0_10, %c0_11, %c0_12] : memref<2x1x1xf32, #tpu.memory_space<vmem>>, vector<2x1x1xf32>
    %18 = arith.mulf %13, %17 : vector<2x1x1xf32>
    %cst_13 = arith.constant dense<0.000000e+00> : vector<2x1xf32>
    %19 = vector.multi_reduction <add>, %16, %cst_13 [2] : vector<2x1x8xf32> to vector<2x1xf32>
    %20 = vector.shape_cast %19 : vector<2x1xf32> to vector<2x1x1xf32>
    %21 = arith.addf %18, %20 : vector<2x1x1xf32>
    %c0_14 = arith.constant 0 : index
    %c0_15 = arith.constant 0 : index
    %c0_16 = arith.constant 0 : index
    %22 = vector.load %arg6[%c0_14, %c0_15, %c0_16] : memref<2x1x1xf32, #tpu.memory_space<vmem>>, vector<2x1x1xf32>
    tpu.vector_store %arg6[%c0_14, %c0_15, %c0_16], %21 {strides = array<i32>} : memref<2x1x1xf32, #tpu.memory_space<vmem>>, vector<2x1x1xf32>,
    %c0_17 = arith.constant 0 : index
    %c0_18 = arith.constant 0 : index
    %c0_19 = arith.constant 0 : index
    %23 = vector.load %arg7[%c0_17, %c0_18, %c0_19] : memref<2x1x32xf32, #tpu.memory_space<vmem>>, vector<2x1x32xf32>
    %24 = vector.broadcast %13 : vector<2x1x1xf32> to vector<2x1x32xf32>
    %25 = arith.mulf %24, %23 : vector<2x1x32xf32>
    "tpu.trace_start"() <{level = 10 : i32, message = "bqk,bkh->bqh"}> : () -> ()
    %cst_20 = arith.constant dense<0.000000e+00> : vector<2x1x32xf32>
    %26 = tpu.matmul %16, %3, %cst_20 {dimension_numbers = #tpu.dot_dimension_numbers<[2], [1], [1], [2], [0, 0, 0, 1, 1, 2], [0], [0]>} : vector<2x1x8xf32>, vector<2x8x32xf32>, vector<2x1x32xf32> -> vector<2x1x32xf32>
    "tpu.trace_stop"() : () -> ()
    %27 = arith.addf %25, %26 : vector<2x1x32xf32>
    %c0_21 = arith.constant 0 : index
    %c0_22 = arith.constant 0 : index
    %c0_23 = arith.constant 0 : index
    %28 = vector.load %arg7[%c0_21, %c0_22, %c0_23] : memref<2x1x32xf32, #tpu.memory_space<vmem>>, vector<2x1x32xf32>
    tpu.vector_store %arg7[%c0_21, %c0_22, %c0_23], %27 {strides = array<i32>} : memref<2x1x32xf32, #tpu.memory_space<vmem>>, vector<2x1x32xf32>,
    %c0_24 = arith.constant 0 : index
    %c0_25 = arith.constant 0 : index
    %c0_26 = arith.constant 0 : index
    %29 = vector.load %arg5[%c0_24, %c0_25, %c0_26] : memref<2x1x1xf32, #tpu.memory_space<vmem>>, vector<2x1x1xf32>
    tpu.vector_store %arg5[%c0_24, %c0_25, %c0_26], %11 {strides = array<i32>} : memref<2x1x1xf32, #tpu.memory_space<vmem>>, vector<2x1x1xf32>,
    %c0_i32_27 = arith.constant 0 : i32
    %30 = arith.cmpi eq, %arg1, %c0_i32_27 : i32
    %31 = arith.extui %30 : i1 to i32
    %c0_i32_28 = arith.constant 0 : i32
    %32 = arith.cmpi ne, %31, %c0_i32_28 : i32
    scf.if %32 {
      %c0_29 = arith.constant 0 : index
      %c0_30 = arith.constant 0 : index
      %c0_31 = arith.constant 0 : index
      %33 = vector.load %arg6[%c0_29, %c0_30, %c0_31] : memref<2x1x1xf32, #tpu.memory_space<vmem>>, vector<2x1x1xf32>
      %34 = tpu.reciprocal %33 {approx = true} : vector<2x1x1xf32> -> vector<2x1x1xf32>
      %35 = arith.mulf %33, %34 : vector<2x1x1xf32>
      %cst_32 = arith.constant 2.000000e+00 : f32
      %36 = vector.broadcast %cst_32 : f32 to vector<2x1x1xf32>
      %37 = arith.subf %36, %35 : vector<2x1x1xf32>
      %38 = arith.mulf %34, %37 : vector<2x1x1xf32>
      %c0_33 = arith.constant 0 : index
      %c0_34 = arith.constant 0 : index
      %c0_35 = arith.constant 0 : index
      %39 = vector.load %arg7[%c0_33, %c0_34, %c0_35] : memref<2x1x32xf32, #tpu.memory_space<vmem>>, vector<2x1x32xf32>
      %40 = vector.broadcast %38 : vector<2x1x1xf32> to vector<2x1x32xf32>
      %41 = arith.mulf %39, %40 : vector<2x1x32xf32>
      %c0_36 = arith.constant 0 : index
      %c0_37 = arith.constant 0 : index
      %c0_38 = arith.constant 0 : index
      %42 = vector.load %arg4[%c0_36, %c0_37, %c0_38] : memref<2x1x32xf32, #tpu.memory_space<vmem>>, vector<2x1x32xf32>
      tpu.vector_store %arg4[%c0_36, %c0_37, %c0_38], %41 {strides = array<i32>} : memref<2x1x32xf32, #tpu.memory_space<vmem>>, vector<2x1x32xf32>,
    } else {
    }
    return
  }
  func.func @transform_0(%arg0: i32, %arg1: i32) -> (i32, i32, i32) {
    %c0_i32 = arith.constant 0 : i32
    %c0_i32_0 = arith.constant 0 : i32
    return %arg0, %arg1, %c0_i32 : i32, i32, i32
  }
  func.func @transform_1(%arg0: i32, %arg1: i32) -> (i32, i32, i32) {
    %c0_i32 = arith.constant 0 : i32
    %c0_i32_0 = arith.constant 0 : i32
    %c0_i32_1 = arith.constant 0 : i32
    %c0_i32_2 = arith.constant 0 : i32
    return %c0_i32, %c0_i32_0, %c0_i32_1 : i32, i32, i32
  }
  func.func @transform_2(%arg0: i32, %arg1: i32) -> (i32, i32, i32) {
    %c0_i32 = arith.constant 0 : i32
    %c0_i32_0 = arith.constant 0 : i32
    %c0_i32_1 = arith.constant 0 : i32
    return %arg0, %c0_i32, %c0_i32_0 : i32, i32, i32
  }
}

</mosaic_0001>

<bundles_post_ra>
// kernel: tpu_custom_call.1
= control target key start
LH: loop header
LB: loop body
LE: loop exit
PB: predicated region body
PF: predicated region fallthrough
CT: control target
= control target key end

     0   :  { %7 = vsyncpa [#allocation6], 0  ;;  %s677_s0 = inlined_call_operand.hbm [shape: f32[2,8,32], index: 0, kind: input, shape index: {}]   ;;  %s678_s1 = inlined_call_operand.vmem [shape: f32[1,1,32], index: 1, kind: input, shape index: {}]   ;;  %s679_s2 = inlined_call_operand.hbm [shape: f32[2,1,32], index: 2, kind: output, shape index: {}]  }
   0x1   :  { %8 = vsyncpa [#allocation7], 0  ;;  %s583_s9 = smov [#allocation5]   ;;  %s535_s13 = scalar_lea.hbm %s677_s0, 256 }
   0x2   :  { %s14_s10 = sshll.u32 %s583_s9, 4  ;;  %p536_p0 = scmp.ne.s32.totalorder %s677_s0, %s535_s13  ;;  %s15_s10 = int_to_ptr.vmem [resolvable:$true] %s14_s10 }
   0x3   :  { %p539_p1 = scmp.lt.u32.totalorder %s535_s13, %s677_s0 }
   0x5   :  { %p541_p2 = pnand %p539_p1, %p536_p0 }
   0x7   :  { %544 = shalt.err (!%p541_p2)
}
   0x8   :  { %s545_s18 = scalar_lea.vmem %s15_s10, 256  ;;  %p550_p4 = scmp.lt.s32.totalorder %s15_s10, %s15_s10 }
   0x9   :  { %p546_p3 = scmp.ne.s32.totalorder %s15_s10, %s545_s18  ;;  %p551_p5 = scmp.lt.s32.totalorder %s545_s18, %s545_s18 }
   0xb   :  { %p552_p6 = por %p551_p5, %p550_p4 }
   0xd   :  { %p553_p7 = pnand %p552_p6, %p546_p3 }
   0xf   :  { %556 = shalt.err (!%p553_p7)
}
  0x10   :  { %s584_s19 = smov 128   ;;  %s585_s20 = smov 8  }
  0x11   :  { %20 = dma.hbm_to_vmem [thread:$0]  %s677_s0, 256, %s15_s10, [#allocation6], %s584_s19, %s584_s19, %s585_s20  }
  0x12   :  { %579 = dma.done.wait [#allocation6], 256  }
  0x13   :  { %580 = vsyncadd [#allocation6], 4294967040  ;;  %v586_v0 = vmov 0.0   ;;  %vm587_vm0 = vmmov 0   ;;  %vm41_vm1 = vcmask 261120   ;;  %v38_v1 = vld [vmem:[#allocation5] sm:$0xff]  ;;  %v213_v20 = vlaneseq }
  0x14   :  { %491 = vmatprep.subr.mxu0 %v586_v0  ;;  %493 = vmatprep.mubr.msk.f32.mxu0 %vm587_vm0, %v586_v0  ;;  %v39_v2 = vld [vmem:[#allocation5 + $0x8] sm:$0xff]  ;;  %v40_v3 = vld [vmem:[%s678_s1] sm:$0x1]  ;;  %vm30_vm2 = vcmask 0   ;;  %v588_v4 = vmov -inf   ;;  %vm193_vm3 = vcmask 57344  }
  0x15   :  { %496 = vmatprep.subr.mxu1 %v586_v0  ;;  %498 = vmatprep.mubr.msk.f32.mxu1 %vm587_vm0, %v586_v0  ;;  %31 = vst.msk [vmem:[#allocation2] sm:$0x1] %vm30_vm2, %v588_v4  ;;  %32 = vst.msk [vmem:[#allocation2 + $0x1] sm:$0x1] %vm30_vm2, %v588_v4  ;;  %v589_v11 = vmov 0   ;;  %v214_v21 = vshrl.u32 %v213_v20, 7 }
  0x16   :  { %492 = vmatpush3.xpose.msk.msra.mxu0 %vm41_vm1, %v38_v1  ;;  %497 = vmatpush3.xpose.msk.msra.mxu1 %vm41_vm1, %v39_v2  ;;  %33 = vst.msk [vmem:[#allocation3] sm:$0x1] %vm30_vm2, %v586_v0  ;;  %34 = vst.msk [vmem:[#allocation3 + $0x1] sm:$0x1] %vm30_vm2, %v586_v0  ;;  %vm269_vm4 = vcmask 64512   ;;  %vm35_vm5 = vcmask 253952  }
  0x17   :  { %501 = vmatprep.subr.mxu0 %v586_v0  ;;  %506 = vmatprep.subr.mxu1 %v586_v0  ;;  %v645_v22 = vsub.s32 0, %v214_v21  ;;  %36 = vst.msk [vmem:[#allocation4] sm:$0x1] %vm35_vm5, %v586_v0  ;;  %37 = vst.msk [vmem:[#allocation4 + $0x1] sm:$0x1] %vm35_vm5, %v586_v0  ;;  %s590_s1 = smov [#allocation8]  }
  0x18   :  { %521 = vset.pattern.permute.xlu1 %v589_v11  ;;  %522 = vset.pattern.permute.xlu0 %v589_v11  ;;  %s465_s24 = sshll.u32 %s590_s1, 4  ;;  %s466_s24 = int_to_ptr.vmem [resolvable:$true] %s465_s24 }
  0x19   :  { %494 = vmatmul.mubr.msk.f32.vlgmr.msra.gmra.mrb[0].mxu0 %vm41_vm1, %v40_v3  ;;  %499 = vmatmul.mubr.msk.f32.vlgmr.msra.gmra.mrb[0].mxu1 %vm41_vm1, %v40_v3  ;;  %s557_s25 = scalar_lea.vmem %s466_s24, 32  ;;  %p562_p9 = scmp.lt.s32.totalorder %s466_s24, %s466_s24 }
  0x1a   :  { %502 = vmatpush3.msra.mxu0 %v38_v1  ;;  %503 = vmatprep.mubr.msk.f32.mxu0 %vm587_vm0, %v586_v0  ;;  %p558_p8 = scmp.ne.s32.totalorder %s466_s24, %s557_s25  ;;  %p563_p10 = scmp.lt.s32.totalorder %s557_s25, %s557_s25 }
  0x1b   :  { %507 = vmatpush3.msra.mxu1 %v39_v2  ;;  %508 = vmatprep.mubr.msk.f32.mxu1 %vm587_vm0, %v586_v0 }
  0x1c   :  { %v191_v12 = vld [vmem:[#allocation2] sm:$0x1]  ;;  %v192_v15 = vld [vmem:[#allocation2 + $0x1] sm:$0x1]  ;;  %p564_p11 = por %p563_p10, %p562_p9 }
  0x1d   :  { %v232_v39 = vld [vmem:[#allocation3] sm:$0x1]  ;;  %v233_v42 = vld [vmem:[#allocation3 + $0x1] sm:$0x1] }
  0x1e   :  { %v247_v60 = vld [vmem:[#allocation4] sm:$0x1]  ;;  %v248_v0 = vld [vmem:[#allocation4 + $0x1] sm:$0x1]  ;;  %p565_p12 = pnand %p564_p11, %p558_p8 }
  0xec   :  { %v114_v5 = vpop.f32.mrb[0].mxu0  ;;  %v187_v6 = vpop.f32.mrb[0].mxu1 }
  0xed   :  { %v495_v7 = vpop.f32.mrb[1].mxu0  ;;  %v194_v8 = vsel %vm193_vm3, %v114_v5, -inf  ;;  %v500_v9 = vpop.f32.mrb[1].mxu1  ;;  %v197_v10 = vsel %vm193_vm3, %v187_v6, -inf }
  0xee   :  { %195 = vmax.xlane.f32.xlu0 %v194_v8 }
  0xf2   :  { %198 = vmax.xlane.f32.xlu0 %v197_v10 }
 0x17b   :  { %v196_v13 = vpop.xlane.xlu0 %195 }
 0x17c   :  { %v200_v14 = vmax.f32 %v191_v12, %v196_v13 }
 0x17e   :  { %v202_v16 = vsub.f32 %v191_v12, %v200_v14  ;;  %421 = vst.msk [vmem:[#allocation2] sm:$0x1] %vm30_vm2, %v200_v14  ;;  %210 = vperm.xlu1 %521, %v200_v14  }
 0x17f   :  { %v199_v17 = vpop.xlane.xlu0 %198 }
 0x180   :  { %v201_v18 = vmax.f32 %v192_v15, %v199_v17  ;;  %v204_v36 = vmul.f32 1.442695, %v202_v16 }
 0x182   :  { %v203_v19 = vsub.f32 %v192_v15, %v201_v18  ;;  %422 = vst.msk [vmem:[#allocation2 + $0x1] sm:$0x1] %vm30_vm2, %v201_v18  ;;  %219 = vperm.xlu1 %521, %v201_v18  }
 0x184   :  { %v206_v35 = vmul.f32 1.442695, %v203_v19 }
 0x1fd   :  { %v211_v23 = vpop.permute.xlu1 %210 }
 0x1fe   :  { %v216_v24 = vrot.slane %v211_v23, %v645_v22 }
 0x200   :  { %v226_v25 = vsub.f32 %v114_v5, %v216_v24 }
 0x201   :  { %v220_v26 = vpop.permute.xlu1 %219 }
 0x202   :  { %v228_v27 = vmul.f32 1.442695, %v226_v25  ;;  %v225_v28 = vrot.slane %v220_v26, %v645_v22 }
 0x204   :  { %523 = vpow2.f32 %v228_v27  ;;  %v227_v29 = vsub.f32 %v187_v6, %v225_v28 }
 0x206   :  { %v230_v30 = vmul.f32 1.442695, %v227_v29 }
 0x208   :  { %525 = vpow2.f32 %v230_v30 }
 0x209   :  { %527 = vpow2.f32 %v206_v35 }
 0x20a   :  { %529 = vpow2.f32 %v204_v36 }
 0x20e   :  { %v524_v31 = vpop.eup %523 }
 0x20f   :  { %504 = vmatmul.mubr.msk.f32.vlgmr.msra.gmra.mrb[2].mxu0 %vm269_vm4, %v524_v31  ;;  %v236_v32 = vsel %vm193_vm3, %v524_v31, 0.0 }
 0x210   :  { %237 = vadd.xlane.f32.xlu0 %v236_v32 }
 0x212   :  { %v526_v33 = vpop.eup %525 }
 0x213   :  { %509 = vmatmul.mubr.msk.f32.vlgmr.msra.gmra.mrb[2].mxu1 %vm269_vm4, %v526_v33  ;;  %v239_v34 = vsel %vm193_vm3, %v526_v33, 0.0  ;;  %v528_v37 = vpop.eup %527 }
 0x214   :  { %240 = vadd.xlane.f32.xlu1 %v239_v34  ;;  %v530_v38 = vpop.eup %529  ;;  %v235_v44 = vmul.f32 %v528_v37, %v233_v42 }
 0x215   :  { %v234_v40 = vmul.f32 %v530_v38, %v232_v39 }
 0x225   :  { %260 = vperm.xlu1 %521, %v528_v37  }
 0x226   :  { %251 = vperm.xlu0 %522, %v530_v38  }
 0x29d   :  { %v238_v41 = vpop.xlane.xlu0 %237 }
 0x29e   :  { %v242_v43 = vadd.f32 %v238_v41, %v234_v40 }
 0x2a0   :  { %245 = vst.msk [vmem:[#allocation3] sm:$0x1] %vm30_vm2, %v242_v43 }
 0x2a1   :  { %v241_v45 = vpop.xlane.xlu1 %240 }
 0x2a2   :  { %v243_v46 = vadd.f32 %v241_v45, %v235_v44 }
 0x2a4   :  { %246 = vst.msk [vmem:[#allocation3 + $0x1] sm:$0x1] %vm30_vm2, %v243_v46 }
 0x2a5   :  { %v252_v57 = vpop.permute.xlu0 %251  ;;  %v261_v59 = vpop.permute.xlu1 %260 }
 0x2a6   :  { %v257_v58 = vrot.slane %v252_v57, %v645_v22  ;;  %v266_v61 = vrot.slane %v261_v59, %v645_v22 }
 0x2a7   :  { %v426_v47 = vld [vmem:[#allocation3] sm:$0x1] }
 0x2a8   :  { %531 = vrcp.f32 %v426_v47  ;;  %v267_v62 = vmul.f32 %v257_v58, %v247_v60  ;;  %v268_v3 = vmul.f32 %v266_v61, %v248_v0 }
 0x2ab   :  { %v427_v48 = vld [vmem:[#allocation3 + $0x1] sm:$0x1] }
 0x2ac   :  { %533 = vrcp.f32 %v427_v48 }
 0x2b2   :  { %v532_v49 = vpop.eup %531 }
 0x2b3   :  { %v430_v50 = vmul.f32 %v532_v49, %v426_v47 }
 0x2b5   :  { %v432_v51 = vsub.f32 2.0, %v430_v50 }
 0x2b6   :  { %v534_v52 = vpop.eup %533 }
 0x2b7   :  { %v434_v53 = vmul.f32 %v532_v49, %v432_v51  ;;  %v431_v54 = vmul.f32 %v534_v52, %v427_v48 }
 0x2b9   :  { %440 = vperm.xlu0 %522, %v434_v53   ;;  %v433_v55 = vsub.f32 2.0, %v431_v54 }
 0x2bb   :  { %v435_v56 = vmul.f32 %v534_v52, %v433_v55 }
 0x2bd   :  { %449 = vperm.xlu0 %522, %v435_v56  }
 0x2e2   :  { %v339_v63 = vpop.f32.mrb[2].mxu0 }
 0x2e3   :  { %v416_v1 = vadd.f32 %v339_v63, %v267_v62  ;;  %v505_v2 = vpop.f32.mrb[3].mxu0 }
 0x2e5   :  { %419 = vst.msk [vmem:[#allocation4] sm:$0x1] %vm35_vm5, %v416_v1 }
 0x2e6   :  { %v412_v4 = vpop.f32.mrb[2].mxu1 }
 0x2e7   :  { %v417_v5 = vadd.f32 %v412_v4, %v268_v3  ;;  %v510_v6 = vpop.f32.mrb[3].mxu1 }
 0x2e9   :  { %420 = vst.msk [vmem:[#allocation4 + $0x1] sm:$0x1] %vm35_vm5, %v417_v5 }
 0x2ec   :  { %v436_v9 = vld [vmem:[#allocation4] sm:$0x1] }
 0x2f0   :  { %v437_v13 = vld [vmem:[#allocation4 + $0x1] sm:$0x1] }
 0x338   :  { %v441_v7 = vpop.permute.xlu0 %440 }
 0x339   :  { %v446_v8 = vrot.slane %v441_v7, %v645_v22 }
 0x33b   :  { %v456_v10 = vmul.f32 %v446_v8, %v436_v9 }
 0x33c   :  { %v450_v11 = vpop.permute.xlu0 %449 }
 0x33d   :  { %458 = vst.msk [vmem:[#allocation8] sm:$0x1] %vm35_vm5, %v456_v10  ;;  %v455_v12 = vrot.slane %v450_v11, %v645_v22 }
 0x33f   :  { %v457_v14 = vmul.f32 %v455_v12, %v437_v13 }
 0x341   :  { %459 = vst.msk [vmem:[#allocation8 + $0x1] sm:$0x1] %vm35_vm5, %v457_v14 }
 0x342   :  { %568 = shalt.err (!%p565_p12)
}
 0x343   :  { %s569_s28 = scalar_lea.hbm %s679_s2, 32 }
 0x344   :  { %p570_p13 = scmp.ne.s32.totalorder %s679_s2, %s569_s28  ;;  %p573_p0 = scmp.lt.u32.totalorder %s569_s28, %s679_s2 }
 0x346   :  { %p575_p1 = pnand %p573_p0, %p570_p13 }
 0x348   :  { %578 = shalt.err (!%p575_p1)
}
 0x349   :  { %s591_s5 = smov 16   ;;  %s592_s6 = smov 1  }
 0x34a   :  { %471 = dma.vmem_to_hbm [thread:$0]  %s466_s24, 32, %s679_s2, [#allocation7], %s591_s5, %s591_s5, %s592_s6  }
 0x34b   :  { %581 = dma.done.wait [#allocation7], 32  }
 0x34c   :  { %582 = vsyncadd [#allocation7], 4294967264 }
 0x34d   :  { %475 = vsyncpa [#allocation6], 1 }
 0x34e   :  { %476 = vsyncpa [#allocation7], 1 }

</bundles_post_ra>
